<compile_context>
chip_gen: v7x
topology: tpu7x:2x2x1
jax: 0.10.0
libtpu: 0.0.40
codegen_flags: <defaults>
</compile_context>

<pallas_src>
import functools

import jax
import jax.numpy as jnp
from jax.experimental import pallas as pl
from jax.experimental.pallas import tpu as pltpu

_LANE = 128


def _round_up(x, m):
    return (x + m - 1) // m * m


def _chip_config():
    """Per-generation knobs: scoped-VMEM cap, row-tile target, roll/mask dtype."""
    kind = ""
    try:
        kind = jax.devices()[0].device_kind.lower()
    except Exception:
        pass
    is_v7 = ("v7" in kind) or ("7x" in kind)
    old_vpu = any(s in kind for s in ("v2", "v3", "v4", "v5"))  # no bf16 VPU
    vmem_limit = (40 if is_v7 else 64) * 1024 * 1024
    target_rows = 1024 if is_v7 else 2048
    roll_bf16 = not old_vpu
    return vmem_limit, target_rows, roll_bf16


def _pick_tile_rows(M, target):
    """Largest multiple of 8 that divides M and is <= target."""
    best = None
    t = 8
    limit = min(M, max(target, 8))
    while t <= limit:
        if M % t == 0:
            best = t
        t += 8
    return best if best is not None else M


@functools.cache
def _roll_shift_sign():
    """Probe pltpu.roll: +1 if it matches np.roll (out[i] = x[i - shift]), else -1."""
    def kern(x_ref, o_ref):
        o_ref[...] = pltpu.roll(x_ref[...], 1, axis=0)

    x = jax.lax.broadcasted_iota(jnp.float32, (8, _LANE), 0)
    y = pl.pallas_call(
        kern, out_shape=jax.ShapeDtypeStruct((8, _LANE), jnp.float32))(x)
    return 1 if int(jax.device_get(y[0, 0])) == 7 else -1


# ----------------------------------- kernels ---------------------------------
def _conv1x1_first_kernel(x_ref, w_ref, h_ref, stats_ref):
    """1x1 conv (bf16 matmul, f32 acc) + lane-dense BN partial stats. No BN prologue."""
    h = jnp.dot(x_ref[...], w_ref[...], preferred_element_type=jnp.float32)
    s = jnp.sum(h, axis=0, keepdims=True)
    ss = jnp.sum(h * h, axis=0, keepdims=True)
    stats_ref[...] = jnp.concatenate([s, ss], axis=1)[None]       # [1, 1, 2*Cout]
    h_ref[...] = h.astype(h_ref.dtype)                            # bf16 inter-stage


def _bn_relu_conv1x1_kernel(h_ref, scale_ref, bias_ref, w_ref, o_ref, stats_ref):
    """Folded prev-BN + ReLU -> 1x1 conv -> lane-dense BN partial stats."""
    a = jnp.maximum(h_ref[...].astype(jnp.float32) * scale_ref[...] + bias_ref[...], 0.0)
    h = jnp.dot(a.astype(jnp.bfloat16), w_ref[...],
                preferred_element_type=jnp.float32)
    s = jnp.sum(h, axis=0, keepdims=True)
    ss = jnp.sum(h * h, axis=0, keepdims=True)
    stats_ref[...] = jnp.concatenate([s, ss], axis=1)[None]
    o_ref[...] = h.astype(o_ref.dtype)


def _conv3x3_kernel(h_ref, scale_ref, bias_ref, w_ref, o_ref, stats_ref, *,
                    H, W, roll_sign, roll_bf16):
    """Folded BN1+ReLU -> 3x3 conv (stride 1, pad 1) as 3 accumulating [HW,3P]@[3P,P] matmuls."""
    HW = H * W
    a = jnp.maximum(h_ref[...].astype(jnp.float32) * scale_ref[...] + bias_ref[...], 0.0)
    if roll_bf16:                      # bf16 rolls/selects on v6e/v7x (bf16 VPU)
        a = a.astype(jnp.bfloat16)

    row = jax.lax.broadcasted_iota(jnp.int32, (HW, 1), 0)
    hh = row // W
    ww = row % W
    mask_h = {-1: hh >= 1, 0: None, 1: hh <= H - 2}
    mask_w = {-1: ww >= 1, 0: None, 1: ww <= W - 2}

    acc = None
    for gi, dh in enumerate((-1, 0, 1)):
        parts = []
        for dw in (-1, 0, 1):
            k = dh * W + dw            # flattened-row offset of the source pixel
            t = a if k == 0 else pltpu.roll(a, (-roll_sign * k) % HW, axis=0)
            m = mask_h[dh]
            if mask_w[dw] is not None:
                m = mask_w[dw] if m is None else (m & mask_w[dw])
            if m is not None:          # zero padding + no wrap-around bleed
                t = jnp.where(m, t, jnp.zeros_like(t))
            parts.append(t)
        cat = jnp.concatenate(parts, axis=1).astype(jnp.bfloat16)  # [HW, 3*P]
        part = jnp.dot(cat, w_ref[gi], preferred_element_type=jnp.float32)
        acc = part if acc is None else acc + part                  # f32 [HW, P]

    s = jnp.sum(acc, axis=0, keepdims=True)
    ss = jnp.sum(acc * acc, axis=0, keepdims=True)
    stats_ref[...] = jnp.concatenate([s, ss], axis=1)[None]
    o_ref[...] = acc.astype(o_ref.dtype)


def _bn_add_relu_kernel(h_ref, x_ref, scale_ref, bias_ref, o_ref, *, C3):
    """BN3 + identity residual + ReLU; writes the unpadded-channel final output."""
    h = h_ref[...].astype(jnp.float32)
    if h.shape[1] != C3:               # drop lane-pad channels (exact zeros) if any
        h = h[:, :C3]
    y = h * scale_ref[...] + bias_ref[...]
    o_ref[...] = jnp.maximum(y + x_ref[...].astype(jnp.float32), 0.0)


# ------------------------------- pallas_call wrappers -------------------------
def _compiler_params(vmem_limit):
    return pltpu.CompilerParams(dimension_semantics=("parallel",),
                                vmem_limit_bytes=vmem_limit)


def _conv1x1_first(x, w, *, tile_rows, vmem_limit):
    M, Cin = x.shape
    Cout = w.shape[1]
    nt = M // tile_rows
    cost = pl.CostEstimate(
        flops=2 * M * Cin * Cout, transcendentals=0,
        bytes_accessed=2 * M * (Cin + Cout) + 2 * Cin * Cout + 8 * nt * Cout)
    return pl.pallas_call(
        _conv1x1_first_kernel,
        grid=(nt,),
        in_specs=[
            pl.BlockSpec((tile_rows, Cin), lambda i: (i, 0)),
            pl.BlockSpec((Cin, Cout), lambda i: (0, 0)),
        ],
        out_specs=(
            pl.BlockSpec((tile_rows, Cout), lambda i: (i, 0)),
            pl.BlockSpec((1, 1, 2 * Cout), lambda i: (i, 0, 0)),
        ),
        out_shape=(
            jax.ShapeDtypeStruct((M, Cout), jnp.bfloat16),
            jax.ShapeDtypeStruct((nt, 1, 2 * Cout), jnp.float32),
        ),
        compiler_params=_compiler_params(vmem_limit),
        cost_estimate=cost,
    )(x, w)


def _bn_relu_conv1x1(h, scale, bias, w, *, tile_rows, vmem_limit):
    M, Cin = h.shape
    Cout = w.shape[1]
    nt = M // tile_rows
    cost = pl.CostEstimate(
        flops=2 * M * Cin * Cout, transcendentals=0,
        bytes_accessed=2 * M * (Cin + Cout) + 2 * Cin * Cout + 8 * nt * Cout)
    return pl.pallas_call(
        _bn_relu_conv1x1_kernel,
        grid=(nt,),
        in_specs=[
            pl.BlockSpec((tile_rows, Cin), lambda i: (i, 0)),
            pl.BlockSpec((1, Cin), lambda i: (0, 0)),
            pl.BlockSpec((1, Cin), lambda i: (0, 0)),
            pl.BlockSpec((Cin, Cout), lambda i: (0, 0)),
        ],
        out_specs=(
            pl.BlockSpec((tile_rows, Cout), lambda i: (i, 0)),
            pl.BlockSpec((1, 1, 2 * Cout), lambda i: (i, 0, 0)),
        ),
        out_shape=(
            jax.ShapeDtypeStruct((M, Cout), jnp.bfloat16),
            jax.ShapeDtypeStruct((nt, 1, 2 * Cout), jnp.float32),
        ),
        compiler_params=_compiler_params(vmem_limit),
        cost_estimate=cost,
    )(h, scale, bias, w)


def _conv3x3(h, scale, bias, w, *, N, H, W, roll_sign, roll_bf16, vmem_limit):
    M, P = h.shape
    HW = H * W
    cost = pl.CostEstimate(flops=2 * M * 9 * P * P, transcendentals=0,
                           bytes_accessed=4 * M * P + 2 * 9 * P * P + 8 * N * P)
    return pl.pallas_call(
        functools.partial(_conv3x3_kernel, H=H, W=W,
                          roll_sign=roll_sign, roll_bf16=roll_bf16),
        grid=(N,),
        in_specs=[
            pl.BlockSpec((HW, P), lambda n: (n, 0)),
            pl.BlockSpec((1, P), lambda n: (0, 0)),
            pl.BlockSpec((1, P), lambda n: (0, 0)),
            pl.BlockSpec((3, 3 * P, P), lambda n: (0, 0, 0)),
        ],
        out_specs=(
            pl.BlockSpec((HW, P), lambda n: (n, 0)),
            pl.BlockSpec((1, 1, 2 * P), lambda n: (n, 0, 0)),
        ),
        out_shape=(
            jax.ShapeDtypeStruct((M, P), jnp.bfloat16),
            jax.ShapeDtypeStruct((N, 1, 2 * P), jnp.float32),
        ),
        compiler_params=_compiler_params(vmem_limit),
        cost_estimate=cost,
    )(h, scale, bias, w)


def _bn_add_relu(h, x, scale, bias, *, tile_rows, C3, vmem_limit):
    M, C3p = h.shape
    nt = M // tile_rows
    cost = pl.CostEstimate(flops=4 * M * C3, transcendentals=0,
                           bytes_accessed=2 * M * C3p + 2 * M * C3 + 4 * M * C3)
    return pl.pallas_call(
        functools.partial(_bn_add_relu_kernel, C3=C3),
        grid=(nt,),
        in_specs=[
            pl.BlockSpec((tile_rows, C3p), lambda i: (i, 0)),
            pl.BlockSpec((tile_rows, C3), lambda i: (i, 0)),
            pl.BlockSpec((1, C3), lambda i: (0, 0)),
            pl.BlockSpec((1, C3), lambda i: (0, 0)),
        ],
        out_specs=pl.BlockSpec((tile_rows, C3), lambda i: (i, 0)),
        out_shape=jax.ShapeDtypeStruct((M, C3), jnp.float32),
        compiler_params=_compiler_params(vmem_limit),
        cost_estimate=cost,
    )(h, x, scale, bias)


def _bn_fold(stats, gamma, beta, count, eps=1e-5):
    """Training-mode BN (biased variance) folded into per-channel scale/bias.

    stats: [nt, 1, 2*C] per-tile (sum || sumsq) computed on f32 activations.
    NOTE: single-pass E[x^2]-E[x]^2 variance; fine at the tolerances used here.
    """
    s = jnp.sum(stats, axis=(0, 1))                # [2*C]
    C = s.shape[0] // 2
    mean = s[:C] / count
    var = jnp.maximum(s[C:] / count - mean * mean, 0.0)
    scale = gamma * jax.lax.rsqrt(var + eps)
    bias = beta - mean * scale
    return scale.reshape(1, -1), bias.reshape(1, -1)


# ----------------------------------- forward ---------------------------------
def bottleneck_forward_nhwc(x_nhwc, kp):
    """Bottleneck forward; activations NHWC end-to-end (no layout transposes)."""
    d = kp["dims"]
    N, H, W, Cin = x_nhwc.shape
    assert Cin == d["Cin"] and d["Cin"] == d["C3"], (
        "identity residual requires inplanes == 4*planes (downsample=None)")
    M = N * H * W
    HW = H * W
    assert M % 8 == 0 and HW % 8 == 0, "unsupported spatial size for this tiling"

    vmem_limit, target_rows, roll_bf16 = _chip_config()
    tile_rows = _pick_tile_rows(M, target_rows)
    roll_sign = _roll_shift_sign()

    # Single bf16 cast of the input; reused as K1 input and K4 residual.
    # No host-side channel padding (blocks use the full channel dim directly).
    x_bf = x_nhwc.reshape(M, Cin).astype(jnp.bfloat16)

    # stage 1: conv1 (1x1) + BN1 partial stats
    h1, st1 = _conv1x1_first(x_bf, kp["w1"], tile_rows=tile_rows,
                             vmem_limit=vmem_limit)
    sc1, bi1 = _bn_fold(st1, kp["g1"], kp["b1"], M)

    # stage 2: BN1 + ReLU -> conv2 (3x3, pad 1) + BN2 partial stats
    h2, st2 = _conv3x3(h1, sc1, bi1, kp["w2"], N=N, H=H, W=W,
                       roll_sign=roll_sign, roll_bf16=roll_bf16,
                       vmem_limit=vmem_limit)
    sc2, bi2 = _bn_fold(st2, kp["g2"], kp["b2"], M)

    # stage 3: BN2 + ReLU -> conv3 (1x1) + BN3 partial stats
    h3, st3 = _bn_relu_conv1x1(h2, sc2, bi2, kp["w3"], tile_rows=tile_rows,
                               vmem_limit=vmem_limit)
    sc3, bi3 = _bn_fold(st3, kp["g3"], kp["b3"], M)
    sc3 = sc3[:, :d["C3"]]
    bi3 = bi3[:, :d["C3"]]

    # stage 4: BN3 + identity residual + ReLU (writes unpadded channels directly)
    out = _bn_add_relu(h3, x_bf, sc3, bi3, tile_rows=tile_rows, C3=d["C3"],
                       vmem_limit=vmem_limit)
    return out.reshape(N, H, W, d["C3"])


def bottleneck_forward_nchw(x_nchw, kp):
    """Thin PyTorch-layout adapter (prefer the NHWC entry point to avoid transposes)."""
    x_nhwc = jnp.transpose(x_nchw, (0, 2, 3, 1))
    y = bottleneck_forward_nhwc(x_nhwc, kp)
    return jnp.transpose(y, (0, 3, 1, 2))


# ------------------------------- parameter handling ---------------------------
def init_torch_params(key, inplanes, planes):
    P = planes
    ks = jax.random.split(key, 9)
    return dict(
        w1=0.1 * jax.random.normal(ks[0], (P, inplanes, 1, 1), jnp.float32),
        w2=0.1 * jax.random.normal(ks[1], (P, P, 3, 3), jnp.float32),
        w3=0.1 * jax.random.normal(ks[2], (4 * P, P, 1, 1), jnp.float32),
        g1=1.0 + 0.1 * jax.random.normal(ks[3], (P,), jnp.float32),
        b1=0.1 * jax.random.normal(ks[4], (P,), jnp.float32),
        g2=1.0 + 0.1 * jax.random.normal(ks[5], (P,), jnp.float32),
        b2=0.1 * jax.random.normal(ks[6], (P,), jnp.float32),
        g3=1.0 + 0.1 * jax.random.normal(ks[7], (4 * P,), jnp.float32),
        b3=0.1 * jax.random.normal(ks[8], (4 * P,), jnp.float32),
    )


def prepare_params(tp, inplanes, planes):
    """Repack PyTorch-layout weights into MXU-friendly (bf16) kernel layouts.

    Only conv *output* channels (and conv2/conv3 input channels) are lane-padded;
    the block input Cin and the final output C3 stay unpadded.
    """
    P, Cin, C3 = planes, inplanes, 4 * planes
    Pp, C3p = _round_up(P, _LANE), _round_up(C3, _LANE)

    def padc(a, r, c):
        return jnp.pad(a, ((0, r - a.shape[0]), (0, c - a.shape[1])))

    def pad1(v, n):
        return jnp.pad(v, (0, n - v.shape[0])).astype(jnp.float32)

    # conv1: [Cin, Pp]
    w1 = padc(jnp.transpose(tp["w1"][:, :, 0, 0]), Cin, Pp).astype(jnp.bfloat16)
    # conv3: [Pp, C3p]
    w3 = padc(jnp.transpose(tp["w3"][:, :, 0, 0]), Pp, C3p).astype(jnp.bfloat16)
    # conv2: grouped by kh -> [3, 3*Pp, Pp], row within group = kw*Pp + ci
    w2 = jnp.transpose(tp["w2"], (2, 3, 1, 0))                     # [kh, kw, ci, co]
    w2 = jnp.pad(w2, ((0, 0), (0, 0), (0, Pp - P), (0, Pp - P)))
    w2 = w2.reshape(3, 3 * Pp, Pp).astype(jnp.bfloat16)

    return dict(
        w1=w1, w2=w2, w3=w3,
        g1=pad1(tp["g1"], Pp), b1=pad1(tp["b1"], Pp),
        g2=pad1(tp["g2"], Pp), b2=pad1(tp["b2"], Pp),
        g3=pad1(tp["g3"], C3p), b3=pad1(tp["b3"], C3p),
        dims=dict(Cin=Cin, P=P, C3=C3, Pp=Pp, C3p=C3p),
    )


# ------------------------------- pure-JAX reference ---------------------------
def _bn_ref(x, g, b, eps=1e-5):
    mean = jnp.mean(x, axis=(0, 2, 3), keepdims=True)
    var = jnp.mean(jnp.square(x - mean), axis=(0, 2, 3), keepdims=True)
    return ((x - mean) * jax.lax.rsqrt(var + eps) * g.reshape(1, -1, 1, 1)
            + b.reshape(1, -1, 1, 1))


def reference_forward(x, tp):
    dn = ("NCHW", "OIHW", "NCHW")
    out = jax.lax.conv_general_dilated(x, tp["w1"], (1, 1), "VALID",
                                       dimension_numbers=dn)
    out = jax.nn.relu(_bn_ref(out, tp["g1"], tp["b1"]))
    out = jax.lax.conv_general_dilated(out, tp["w2"], (1, 1), ((1, 1), (1, 1)),
                                       dimension_numbers=dn)
    out = jax.nn.relu(_bn_ref(out, tp["g2"], tp["b2"]))
    out = jax.lax.conv_general_dilated(out, tp["w3"], (1, 1), "VALID",
                                       dimension_numbers=dn)
    out = _bn_ref(out, tp["g3"], tp["b3"])
    return jax.nn.relu(out + x)


if __name__ == "__main__":
    planes = 4
    inplanes = 4 * planes          # required for the identity residual path
    N, H, W = 2, 16, 16

    key = jax.random.PRNGKey(0)
    kx, kp_key = jax.random.split(key)
    x = jax.random.normal(kx, (N, inplanes, H, W), jnp.float32)

    torch_params = init_torch_params(kp_key, inplanes, planes)
    kernel_params = prepare_params(torch_params, inplanes, planes)

    y = bottleneck_forward_nchw(x, kernel_params)
    y = jax.block_until_ready(y)

    y_ref = reference_forward(x, torch_params)
    assert y.shape == (N, inplanes, H, W)
    # bf16 MXU feed + bf16 inter-stage activations/residual vs f32 reference
    # (f32 accumulation, f32 BN stats) -> loosened tolerance.
    err = float(jnp.max(jnp.abs(y - y_ref)))
    assert jnp.allclose(y, y_ref, rtol=5e-2, atol=5e-2), (
        f"mismatch vs reference: max abs err = {err}")

    print("KERNEL_OK")
</pallas_src>

<mosaic_0001>
module attributes {stable_mosaic.version = 11 : i64} {
  func.func @kern(%arg0: memref<8x128xf32, #tpu.memory_space<vmem>>, %arg1: memref<8x128xf32, #tpu.memory_space<vmem>>) attributes {dimension_semantics = [], scalar_prefetch = 0 : i64, scratch_operands = 0 : i64, tpu.core_type = #tpu.core_type<tc>} {
    %c0 = arith.constant 0 : index
    %c0_0 = arith.constant 0 : index
    %0 = vector.load %arg0[%c0, %c0_0] : memref<8x128xf32, #tpu.memory_space<vmem>>, vector<8x128xf32>
    %c1_i32 = arith.constant 1 : i32
    %1 = tpu.dynamic_rotate %0 by %c1_i32 dim 0 : vector<8x128xf32>, i32 -> vector<8x128xf32>
    %c0_1 = arith.constant 0 : index
    %c0_2 = arith.constant 0 : index
    %2 = vector.load %arg1[%c0_1, %c0_2] : memref<8x128xf32, #tpu.memory_space<vmem>>, vector<8x128xf32>
    tpu.vector_store %arg1[%c0_1, %c0_2], %1 {strides = array<i32>} : memref<8x128xf32, #tpu.memory_space<vmem>>, vector<8x128xf32>,
    return
  }
}

</mosaic_0001>

<bundles_post_ra>
// kernel: tpu_custom_call.1
= control target key start
LH: loop header
LB: loop body
LE: loop exit
PB: predicated region body
PF: predicated region fallthrough
CT: control target
= control target key end

     0   :  { %6 = vsyncpa [#allocation3], 0  ;;  %s125_s0 = inlined_call_operand.hbm [shape: f32[8,128], index: 0, kind: input, shape index: {}]   ;;  %s126_s1 = inlined_call_operand.hbm [shape: f32[8,128], index: 1, kind: output, shape index: {}]  }
   0x1   :  { %7 = vsyncpa [#allocation4], 0  ;;  %s89_s6 = smov [#allocation2]   ;;  %s41_s10 = scalar_lea.hbm %s125_s0, 128 }
   0x2   :  { %s14_s7 = sshll.u32 %s89_s6, 4  ;;  %p42_p0 = scmp.ne.s32.totalorder %s125_s0, %s41_s10  ;;  %s15_s7 = int_to_ptr.vmem [resolvable:$true] %s14_s7 }
   0x3   :  { %p45_p1 = scmp.lt.u32.totalorder %s41_s10, %s125_s0 }
   0x5   :  { %p47_p2 = pnand %p45_p1, %p42_p0 }
   0x7   :  { %50 = shalt.err (!%p47_p2)
}
   0x8   :  { %s51_s15 = scalar_lea.vmem %s15_s7, 128  ;;  %p56_p4 = scmp.lt.s32.totalorder %s15_s7, %s15_s7 }
   0x9   :  { %p52_p3 = scmp.ne.s32.totalorder %s15_s7, %s51_s15  ;;  %p57_p5 = scmp.lt.s32.totalorder %s51_s15, %s51_s15 }
   0xb   :  { %p58_p6 = por %p57_p5, %p56_p4 }
   0xd   :  { %p59_p7 = pnand %p58_p6, %p52_p3 }
   0xf   :  { %62 = shalt.err (!%p59_p7)
}
  0x10   :  { %17 = dma.hbm_to_vmem [thread:$0]  %s125_s0, 128, %s15_s7, [#allocation3]  }
  0x11   :  { %85 = dma.done.wait [#allocation3], 128  }
  0x12   :  { %86 = vsyncadd [#allocation3], 4294967168  ;;  %s90_s18 = smov [#allocation5]   ;;  %v21_v0 = vld [vmem:[#allocation2] sm:$0xff] }
  0x13   :  { %s30_s19 = sshll.u32 %s90_s18, 4  ;;  %v22_v1 = vrot.slane %v21_v0, 7  ;;  %s31_s19 = int_to_ptr.vmem [resolvable:$true] %s30_s19 }
  0x14   :  { %s63_s20 = scalar_lea.vmem %s31_s19, 128  ;;  %p68_p9 = scmp.lt.s32.totalorder %s31_s19, %s31_s19 }
  0x15   :  { %23 = vst [vmem:[#allocation5] sm:$0xff] %v22_v1  ;;  %p64_p8 = scmp.ne.s32.totalorder %s31_s19, %s63_s20  ;;  %p69_p10 = scmp.lt.s32.totalorder %s63_s20, %s63_s20 }
  0x17   :  { %p70_p11 = por %p69_p10, %p68_p9 }
  0x19   :  { %p71_p12 = pnand %p70_p11, %p64_p8 }
  0x1b   :  { %74 = shalt.err (!%p71_p12)
}
  0x1c   :  { %s75_s23 = scalar_lea.hbm %s126_s1, 128 }
  0x1d   :  { %p76_p13 = scmp.ne.s32.totalorder %s126_s1, %s75_s23  ;;  %p79_p0 = scmp.lt.u32.totalorder %s75_s23, %s126_s1 }
  0x1f   :  { %p81_p1 = pnand %p79_p0, %p76_p13 }
  0x21   :  { %84 = shalt.err (!%p81_p1)
}
  0x22   :  { %33 = dma.vmem_to_hbm [thread:$0]  %s31_s19, 128, %s126_s1, [#allocation4]  }
  0x23   :  { %87 = dma.done.wait [#allocation4], 128  }
  0x24   :  { %88 = vsyncadd [#allocation4], 4294967168 }
  0x25   :  { %37 = vsyncpa [#allocation3], 1 }
  0x26   :  { %38 = vsyncpa [#allocation4], 1 }

</bundles_post_ra>
